<compile_context>
chip_gen: v6e
topology: v6e:2x2x1
jax: 0.10.0
libtpu: 0.0.40
codegen_flags: <defaults>
</compile_context>

<pallas_src>
import functools
import math

import jax
import jax.numpy as jnp
from jax import lax
from jax.experimental import pallas as pl
from jax.experimental.pallas import tpu as pltpu

_LN_EPS = 1e-5
_VMEM_LIMIT = 32 * 1024 * 1024  # conservative: fits v5e/v6e/v7x scoped VMEM


def _pick_tile(m, preferred=256):
    """Largest tile <= preferred that divides m and is a multiple of 8 (else full m)."""
    if m <= preferred:
        return m
    t = (preferred // 8) * 8
    while t >= 8:
        if m % t == 0:
            return t
        t -= 8
    return m


def _layer_norm_f32(x, gamma, beta, eps):
    mu = jnp.mean(x, axis=-1, keepdims=True)
    var = jnp.mean(jnp.square(x - mu), axis=-1, keepdims=True)
    return (x - mu) * lax.rsqrt(var + eps) * gamma + beta


# ---------------- kernel 1: norm1 + qkv projection (tiled over tokens) ----------------
def _ln_linear_kernel(x_ref, g_ref, be_ref, w_ref, b_ref, o_ref, *, eps):
    x = x_ref[...].astype(jnp.float32)                      # (TM, C)
    xn = _layer_norm_f32(x, g_ref[...].astype(jnp.float32),
                         be_ref[...].astype(jnp.float32), eps)
    w = w_ref[...]
    out = jnp.dot(xn.astype(w.dtype), w,
                  preferred_element_type=jnp.float32)
    out = out + b_ref[...].astype(jnp.float32)
    o_ref[...] = out.astype(o_ref.dtype)


def ln_linear_pallas(x, gamma, beta, w, b, *, eps=_LN_EPS, tm=256):
    m, c = x.shape
    n = w.shape[1]
    tm = _pick_tile(m, tm)
    cost = pl.CostEstimate(
        flops=2 * m * c * n + 8 * m * c,
        transcendentals=m,
        bytes_accessed=4 * (m * c + c * n + n + 2 * c + m * n))
    return pl.pallas_call(
        functools.partial(_ln_linear_kernel, eps=eps),
        out_shape=jax.ShapeDtypeStruct((m, n), x.dtype),
        grid=(m // tm,),
        in_specs=[
            pl.BlockSpec((tm, c), lambda i: (i, 0)),   # x tile
            pl.BlockSpec((1, c), lambda i: (0, 0)),    # ln gamma (resident)
            pl.BlockSpec((1, c), lambda i: (0, 0)),    # ln beta
            pl.BlockSpec((c, n), lambda i: (0, 0)),    # qkv weight (resident)
            pl.BlockSpec((1, n), lambda i: (0, 0)),    # qkv bias
        ],
        out_specs=pl.BlockSpec((tm, n), lambda i: (i, 0)),
        compiler_params=pltpu.CompilerParams(
            dimension_semantics=("parallel",),
            vmem_limit_bytes=_VMEM_LIMIT),
        cost_estimate=cost,
    )(x, gamma.reshape(1, c), beta.reshape(1, c), w, b.reshape(1, n))


# ---------------- kernel 2: windowed multi-head attention ----------------
def _ocab_attn_kernel(q_ref, k_ref, v_ref, bias_ref, o_ref, *,
                      num_heads, head_dim, scale):
    q = q_ref[...]                                          # (WB, nq, C)
    k = k_ref[...]                                          # (WB, n,  C)
    v = v_ref[...]
    outs = []
    for h in range(num_heads):
        sl = slice(h * head_dim, (h + 1) * head_dim)
        qh = q[..., sl] * scale
        kh = k[..., sl]
        vh = v[..., sl]
        s = jnp.einsum('bqd,bkd->bqk', qh, kh,
                       preferred_element_type=jnp.float32)  # (WB, nq, n)
        s = s + bias_ref[h].astype(jnp.float32)
        s = s - jnp.max(s, axis=-1, keepdims=True)
        p = jnp.exp(s)
        p = p / jnp.sum(p, axis=-1, keepdims=True)
        outs.append(jnp.einsum('bqk,bkd->bqd', p.astype(vh.dtype), vh,
                               preferred_element_type=jnp.float32))
    o_ref[...] = jnp.concatenate(outs, axis=-1).astype(o_ref.dtype)


def window_attention_pallas(q, k, v, bias, *, num_heads, scale,
                            windows_per_block=4):
    nwt, nq, c = q.shape
    _, n, _ = k.shape
    d = c // num_heads
    wb = min(nwt, windows_per_block)
    while nwt % wb:
        wb -= 1
    cost = pl.CostEstimate(
        flops=4 * nwt * nq * n * c,
        transcendentals=nwt * num_heads * nq * n,
        bytes_accessed=4 * (2 * nwt * nq * c + 2 * nwt * n * c + num_heads * nq * n))
    return pl.pallas_call(
        functools.partial(_ocab_attn_kernel, num_heads=num_heads,
                          head_dim=d, scale=scale),
        out_shape=jax.ShapeDtypeStruct((nwt, nq, c), q.dtype),
        grid=(nwt // wb,),
        in_specs=[
            pl.BlockSpec((wb, nq, c), lambda i: (i, 0, 0)),        # q windows
            pl.BlockSpec((wb, n, c), lambda i: (i, 0, 0)),         # k windows
            pl.BlockSpec((wb, n, c), lambda i: (i, 0, 0)),         # v windows
            pl.BlockSpec((num_heads, nq, n), lambda i: (0, 0, 0)),  # rel-pos bias (resident)
        ],
        out_specs=pl.BlockSpec((wb, nq, c), lambda i: (i, 0, 0)),
        compiler_params=pltpu.CompilerParams(
            dimension_semantics=("parallel",),
            vmem_limit_bytes=_VMEM_LIMIT),
        cost_estimate=cost,
    )(q, k, v, bias)


# -------- kernel 3: proj + residual + norm2 + MLP + residual (tiled over tokens) --------
def _proj_mlp_kernel(a_ref, sc_ref, wp_ref, bp_ref, g2_ref, be2_ref,
                     w1_ref, b1_ref, w2_ref, b2_ref, o_ref, *, eps):
    a = a_ref[...]
    wp = wp_ref[...]
    y = jnp.dot(a.astype(wp.dtype), wp, preferred_element_type=jnp.float32)
    y = y + bp_ref[...].astype(jnp.float32) + sc_ref[...].astype(jnp.float32)
    z = _layer_norm_f32(y, g2_ref[...].astype(jnp.float32),
                        be2_ref[...].astype(jnp.float32), eps)
    w1 = w1_ref[...]
    h = jnp.dot(z.astype(w1.dtype), w1, preferred_element_type=jnp.float32)
    h = h + b1_ref[...].astype(jnp.float32)
    # exact GELU (matches torch nn.GELU default); dropout(p=0.0) is identity.
    h = 0.5 * h * (1.0 + lax.erf(h * (1.0 / math.sqrt(2.0))))
    w2 = w2_ref[...]
    mlp = jnp.dot(h.astype(w2.dtype), w2, preferred_element_type=jnp.float32)
    mlp = mlp + b2_ref[...].astype(jnp.float32)
    o_ref[...] = (y + mlp).astype(o_ref.dtype)


def proj_mlp_pallas(attn, shortcut, wp, bp, g2, be2, w1, b1, w2, b2,
                    *, eps=_LN_EPS, tm=256):
    m, c = attn.shape
    hd = w1.shape[1]
    tm = _pick_tile(m, tm)
    cost = pl.CostEstimate(
        flops=2 * m * (c * c + 2 * c * hd) + 16 * m * c,
        transcendentals=m * hd + m,
        bytes_accessed=4 * (3 * m * c + c * c + 2 * c * hd + 4 * c + hd + 2 * c))
    return pl.pallas_call(
        functools.partial(_proj_mlp_kernel, eps=eps),
        out_shape=jax.ShapeDtypeStruct((m, c), attn.dtype),
        grid=(m // tm,),
        in_specs=[
            pl.BlockSpec((tm, c), lambda i: (i, 0)),   # attention output tile
            pl.BlockSpec((tm, c), lambda i: (i, 0)),   # residual shortcut tile
            pl.BlockSpec((c, c), lambda i: (0, 0)),    # proj weight (resident)
            pl.BlockSpec((1, c), lambda i: (0, 0)),    # proj bias
            pl.BlockSpec((1, c), lambda i: (0, 0)),    # norm2 gamma
            pl.BlockSpec((1, c), lambda i: (0, 0)),    # norm2 beta
            pl.BlockSpec((c, hd), lambda i: (0, 0)),   # fc1 weight
            pl.BlockSpec((1, hd), lambda i: (0, 0)),   # fc1 bias
            pl.BlockSpec((hd, c), lambda i: (0, 0)),   # fc2 weight
            pl.BlockSpec((1, c), lambda i: (0, 0)),    # fc2 bias
        ],
        out_specs=pl.BlockSpec((tm, c), lambda i: (i, 0)),
        compiler_params=pltpu.CompilerParams(
            dimension_semantics=("parallel",),
            vmem_limit_bytes=_VMEM_LIMIT),
        cost_estimate=cost,
    )(attn, shortcut, wp, bp.reshape(1, c), g2.reshape(1, c), be2.reshape(1, c),
      w1, b1.reshape(1, hd), w2, b2.reshape(1, c))


# ---------------- data rearrangement (pure index shuffles, plain JAX) ----------------
def _window_partition(x, ws):
    b, h, w, c = x.shape
    nh, nw = h // ws, w // ws
    x = x.reshape(b, nh, ws, nw, ws, c).transpose(0, 1, 3, 2, 4, 5)
    return x.reshape(b * nh * nw, ws * ws, c)


def _window_reverse(wins, ws, h, w):
    c = wins.shape[-1]
    b = wins.shape[0] // ((h // ws) * (w // ws))
    x = wins.reshape(b, h // ws, w // ws, ws, ws, c).transpose(0, 1, 3, 2, 4, 5)
    return x.reshape(b, h * w, c)


def _overlap_partition(x, ws, ows):
    """Equivalent of nn.Unfold(kernel=(ows,ows), stride=ws, padding=(ows-ws)//2)
    + rearrange into per-window (ows*ows, c) slabs, channel-last."""
    b, h, w, c = x.shape
    pad = (ows - ws) // 2
    xp = jnp.pad(x, ((0, 0), (pad, pad), (pad, pad), (0, 0)))
    nh, nw = h // ws, w // ws
    idx_h = (jnp.arange(nh) * ws)[:, None] + jnp.arange(ows)[None, :]   # (nh, ows)
    idx_w = (jnp.arange(nw) * ws)[:, None] + jnp.arange(ows)[None, :]   # (nw, ows)
    patches = xp[:, idx_h]                 # (b, nh, ows, w+2p, c)
    patches = patches[:, :, :, idx_w]      # (b, nh, ows, nw, ows, c)
    patches = patches.transpose(0, 1, 3, 2, 4, 5)
    return patches.reshape(b * nh * nw, ows * ows, c)


# ---------------- full OCAB forward ----------------
def ocab_forward(x, x_size, rpi, p, *, window_size, overlap_ratio, num_heads):
    h, w = x_size
    b, seq, c = x.shape
    assert seq == h * w
    ws = window_size
    ows = int(ws * overlap_ratio) + ws
    d = c // num_heads
    scale = d ** (-0.5)
    m = b * seq

    shortcut = x.reshape(m, c)

    # norm1 + qkv projection (fused Pallas kernel)
    qkv = ln_linear_pallas(shortcut, p['g1'], p['be1'], p['w_qkv'], p['b_qkv'])
    qkv = qkv.reshape(b, h, w, 3 * c)
    q, k, v = qkv[..., :c], qkv[..., c:2 * c], qkv[..., 2 * c:]

    q_win = _window_partition(q, ws)               # (nw_tot, ws*ws, c)
    k_win = _overlap_partition(k, ws, ows)         # (nw_tot, ows*ows, c)
    v_win = _overlap_partition(v, ws, ows)

    nq, n = ws * ws, ows * ows
    rpb = p['rpb_table'][rpi.reshape(-1)].reshape(nq, n, num_heads)
    rpb = jnp.transpose(rpb, (2, 0, 1))            # (H, nq, n)

    attn = window_attention_pallas(q_win, k_win, v_win, rpb,
                                   num_heads=num_heads, scale=scale)

    attn = _window_reverse(attn, ws, h, w).reshape(m, c)

    # proj + residual + norm2 + MLP + residual (fused Pallas kernel)
    out = proj_mlp_pallas(attn, shortcut, p['w_proj'], p['b_proj'],
                          p['g2'], p['be2'], p['w1'], p['b1'], p['w2'], p['b2'])
    return out.reshape(b, seq, c)


# ---------------- plain-JAX reference for the correctness check ----------------
def ocab_reference(x, x_size, rpi, p, *, window_size, overlap_ratio, num_heads):
    h, w = x_size
    b, seq, c = x.shape
    ws = window_size
    ows = int(ws * overlap_ratio) + ws
    d = c // num_heads
    scale = d ** (-0.5)

    def ln(t, g, be):
        mu = jnp.mean(t, axis=-1, keepdims=True)
        var = jnp.mean(jnp.square(t - mu), axis=-1, keepdims=True)
        return (t - mu) * lax.rsqrt(var + _LN_EPS) * g + be

    shortcut = x
    xn = ln(x, p['g1'], p['be1'])
    qkv = xn @ p['w_qkv'] + p['b_qkv']
    qkv = qkv.reshape(b, h, w, 3 * c)
    q, k, v = qkv[..., :c], qkv[..., c:2 * c], qkv[..., 2 * c:]
    q_win = _window_partition(q, ws)
    k_win = _overlap_partition(k, ws, ows)
    v_win = _overlap_partition(v, ws, ows)
    nwt, nq, _ = q_win.shape
    n = ows * ows
    qh = q_win.reshape(nwt, nq, num_heads, d).transpose(0, 2, 1, 3) * scale
    kh = k_win.reshape(nwt, n, num_heads, d).transpose(0, 2, 1, 3)
    vh = v_win.reshape(nwt, n, num_heads, d).transpose(0, 2, 1, 3)
    attn = jnp.einsum('whqd,whkd->whqk', qh, kh)
    rpb = p['rpb_table'][rpi.reshape(-1)].reshape(nq, n, num_heads).transpose(2, 0, 1)
    attn = jax.nn.softmax(attn + rpb[None], axis=-1)
    out = jnp.einsum('whqk,whkd->whqd', attn, vh).transpose(0, 2, 1, 3).reshape(nwt, nq, c)
    out = _window_reverse(out, ws, h, w)
    y = out @ p['w_proj'] + p['b_proj'] + shortcut
    z = ln(y, p['g2'], p['be2'])
    mlp = z @ p['w1'] + p['b1']
    mlp = 0.5 * mlp * (1.0 + lax.erf(mlp / math.sqrt(2.0)))
    mlp = mlp @ p['w2'] + p['b2']
    return y + mlp


def init_ocab_params(key, dim, window_size, overlap_ratio, num_heads,
                     mlp_ratio=2, dtype=jnp.float32):
    ows = int(window_size * overlap_ratio) + window_size
    hidden = int(dim * mlp_ratio)
    ks = jax.random.split(key, 5)

    def linear(kk, fan_in, fan_out):
        kw, kb = jax.random.split(kk)
        bound = 1.0 / math.sqrt(fan_in)
        # stored (in, out) — transposed vs torch nn.Linear's (out, in)
        wt = jax.random.uniform(kw, (fan_in, fan_out), dtype, -bound, bound)
        bv = jax.random.uniform(kb, (fan_out,), dtype, -bound, bound)
        return wt, bv

    w_qkv, b_qkv = linear(ks[0], dim, 3 * dim)
    w_proj, b_proj = linear(ks[1], dim, dim)
    w1, b1 = linear(ks[2], dim, hidden)
    w2, b2 = linear(ks[3], hidden, dim)
    table_len = (window_size + ows - 1) ** 2
    rpb_table = 0.02 * jax.random.normal(ks[4], (table_len, num_heads), dtype)
    return dict(
        g1=jnp.ones((dim,), dtype), be1=jnp.zeros((dim,), dtype),
        w_qkv=w_qkv, b_qkv=b_qkv, rpb_table=rpb_table,
        w_proj=w_proj, b_proj=b_proj,
        g2=jnp.ones((dim,), dtype), be2=jnp.zeros((dim,), dtype),
        w1=w1, b1=b1, w2=w2, b2=b2,
    )


if __name__ == "__main__":
    key = jax.random.PRNGKey(0)
    kx, kp, kr = jax.random.split(key, 3)

    dim = 32
    num_heads = 2
    window_size = 8
    overlap_ratio = 0.5
    h = w = 16
    b = 2
    ows = int(window_size * overlap_ratio) + window_size   # 12

    x = jax.random.normal(kx, (b, h * w, dim), dtype=jnp.float32)
    rpi = jax.random.randint(kr, (window_size * window_size, ows * ows),
                             0, (window_size + ows - 1) ** 2)
    params = init_ocab_params(kp, dim, window_size, overlap_ratio, num_heads)

    y = ocab_forward(x, (h, w), rpi, params, window_size=window_size,
                     overlap_ratio=overlap_ratio, num_heads=num_heads)
    y = jax.block_until_ready(y)

    y_ref = ocab_reference(x, (h, w), rpi, params, window_size=window_size,
                           overlap_ratio=overlap_ratio, num_heads=num_heads)
    assert y.shape == (b, h * w, dim)
    assert jnp.allclose(y, y_ref, atol=1e-4, rtol=1e-4), \
        float(jnp.max(jnp.abs(y - y_ref)))

    print("KERNEL_OK")
</pallas_src>

<mosaic_0001>
module attributes {stable_mosaic.version = 11 : i64} {
  func.func @_ln_linear_kernel(%arg0: i32, %arg1: memref<256x32xf32, #tpu.memory_space<vmem>>, %arg2: memref<1x32xf32, #tpu.memory_space<vmem>>, %arg3: memref<1x32xf32, #tpu.memory_space<vmem>>, %arg4: memref<32x96xf32, #tpu.memory_space<vmem>>, %arg5: memref<1x96xf32, #tpu.memory_space<vmem>>, %arg6: memref<256x96xf32, #tpu.memory_space<vmem>>) attributes {dimension_semantics = [#tpu.dimension_semantics<parallel>], iteration_bounds = array<i64: 2>, scalar_prefetch = 0 : i64, scratch_operands = 0 : i64, tpu.core_type = #tpu.core_type<tc>, window_params = [{transform_indices = @transform_0, window_bounds = array<i64: 256, 32>}, {pipeline_mode = #tpu.pipeline_mode<synchronous>, transform_indices = @transform_1, window_bounds = array<i64: 1, 32>}, {pipeline_mode = #tpu.pipeline_mode<synchronous>, transform_indices = @transform_2, window_bounds = array<i64: 1, 32>}, {pipeline_mode = #tpu.pipeline_mode<synchronous>, transform_indices = @transform_3, window_bounds = array<i64: 32, 96>}, {pipeline_mode = #tpu.pipeline_mode<synchronous>, transform_indices = @transform_4, window_bounds = array<i64: 1, 96>}, {transform_indices = @transform_5, window_bounds = array<i64: 256, 96>}]} {
    %c0 = arith.constant 0 : index
    %c0_0 = arith.constant 0 : index
    %0 = vector.load %arg1[%c0, %c0_0] : memref<256x32xf32, #tpu.memory_space<vmem>>, vector<256x32xf32>
    %c0_1 = arith.constant 0 : index
    %c0_2 = arith.constant 0 : index
    %1 = vector.load %arg2[%c0_1, %c0_2] : memref<1x32xf32, #tpu.memory_space<vmem>>, vector<1x32xf32>
    %c0_3 = arith.constant 0 : index
    %c0_4 = arith.constant 0 : index
    %2 = vector.load %arg3[%c0_3, %c0_4] : memref<1x32xf32, #tpu.memory_space<vmem>>, vector<1x32xf32>
    %cst = arith.constant dense<0.000000e+00> : vector<256xf32>
    %3 = vector.multi_reduction <add>, %0, %cst [1] : vector<256x32xf32> to vector<256xf32>
    %4 = vector.shape_cast %3 : vector<256xf32> to vector<256x1xf32>
    %cst_5 = arith.constant 3.200000e+01 : f32
    %5 = vector.broadcast %cst_5 : f32 to vector<256x1xf32>
    %6 = arith.divf %4, %5 : vector<256x1xf32>
    %7 = vector.broadcast %6 : vector<256x1xf32> to vector<256x32xf32>
    %8 = arith.subf %0, %7 : vector<256x32xf32>
    %9 = arith.mulf %8, %8 : vector<256x32xf32>
    %cst_6 = arith.constant dense<0.000000e+00> : vector<256xf32>
    %10 = vector.multi_reduction <add>, %9, %cst_6 [1] : vector<256x32xf32> to vector<256xf32>
    %11 = vector.shape_cast %10 : vector<256xf32> to vector<256x1xf32>
    %cst_7 = arith.constant 3.200000e+01 : f32
    %12 = vector.broadcast %cst_7 : f32 to vector<256x1xf32>
    %13 = arith.divf %11, %12 : vector<256x1xf32>
    %14 = vector.broadcast %6 : vector<256x1xf32> to vector<256x32xf32>
    %15 = arith.subf %0, %14 : vector<256x32xf32>
    %cst_8 = arith.constant 9.99999974E-6 : f32
    %16 = vector.broadcast %cst_8 : f32 to vector<256x1xf32>
    %17 = arith.addf %13, %16 : vector<256x1xf32>
    %18 = math.rsqrt %17 : vector<256x1xf32>
    %19 = vector.broadcast %18 : vector<256x1xf32> to vector<256x32xf32>
    %20 = arith.mulf %15, %19 : vector<256x32xf32>
    %21 = vector.broadcast %1 : vector<1x32xf32> to vector<256x32xf32>
    %22 = arith.mulf %20, %21 : vector<256x32xf32>
    %23 = vector.broadcast %2 : vector<1x32xf32> to vector<256x32xf32>
    %24 = arith.addf %22, %23 : vector<256x32xf32>
    %c0_9 = arith.constant 0 : index
    %c0_10 = arith.constant 0 : index
    %25 = vector.load %arg4[%c0_9, %c0_10] : memref<32x96xf32, #tpu.memory_space<vmem>>, vector<32x96xf32>
    %cst_11 = arith.constant dense<0.000000e+00> : vector<256x96xf32>
    %26 = tpu.matmul %24, %25, %cst_11 {dimension_numbers = #tpu.dot_dimension_numbers<[1], [0], [0], [1], [0, 0, 1, 1], [], []>} : vector<256x32xf32>, vector<32x96xf32>, vector<256x96xf32> -> vector<256x96xf32>
    %c0_12 = arith.constant 0 : index
    %c0_13 = arith.constant 0 : index
    %27 = vector.load %arg5[%c0_12, %c0_13] : memref<1x96xf32, #tpu.memory_space<vmem>>, vector<1x96xf32>
    %28 = vector.broadcast %27 : vector<1x96xf32> to vector<256x96xf32>
    %29 = arith.addf %26, %28 : vector<256x96xf32>
    %c0_14 = arith.constant 0 : index
    %c0_15 = arith.constant 0 : index
    %30 = vector.load %arg6[%c0_14, %c0_15] : memref<256x96xf32, #tpu.memory_space<vmem>>, vector<256x96xf32>
    tpu.vector_store %arg6[%c0_14, %c0_15], %29 {strides = array<i32>} : memref<256x96xf32, #tpu.memory_space<vmem>>, vector<256x96xf32>,
    return
  }
  func.func @transform_0(%arg0: i32) -> (i32, i32) {
    %c0_i32 = arith.constant 0 : i32
    %c0_i32_0 = arith.constant 0 : i32
    return %arg0, %c0_i32 : i32, i32
  }
  func.func @transform_1(%arg0: i32) -> (i32, i32) {
    %c0_i32 = arith.constant 0 : i32
    %c0_i32_0 = arith.constant 0 : i32
    %c0_i32_1 = arith.constant 0 : i32
    return %c0_i32, %c0_i32_0 : i32, i32
  }
  func.func @transform_2(%arg0: i32) -> (i32, i32) {
    %c0_i32 = arith.constant 0 : i32
    %c0_i32_0 = arith.constant 0 : i32
    %c0_i32_1 = arith.constant 0 : i32
    return %c0_i32, %c0_i32_0 : i32, i32
  }
  func.func @transform_3(%arg0: i32) -> (i32, i32) {
    %c0_i32 = arith.constant 0 : i32
    %c0_i32_0 = arith.constant 0 : i32
    %c0_i32_1 = arith.constant 0 : i32
    return %c0_i32, %c0_i32_0 : i32, i32
  }
  func.func @transform_4(%arg0: i32) -> (i32, i32) {
    %c0_i32 = arith.constant 0 : i32
    %c0_i32_0 = arith.constant 0 : i32
    %c0_i32_1 = arith.constant 0 : i32
    return %c0_i32, %c0_i32_0 : i32, i32
  }
  func.func @transform_5(%arg0: i32) -> (i32, i32) {
    %c0_i32 = arith.constant 0 : i32
    %c0_i32_0 = arith.constant 0 : i32
    return %arg0, %c0_i32 : i32, i32
  }
}

</mosaic_0001>

<bundles_post_ra>
// kernel: tpu_custom_call.1
= control target key start
LH: loop header
LB: loop body
LE: loop exit
PB: predicated region body
PF: predicated region fallthrough
CT: control target
= control target key end

     0   :  { %s1433_s18 = smov 0   ;;  %s2064_s0 = inlined_call_operand.vmem [shape: f32[512,32], index: 0, kind: input, shape index: {}]   ;;  %s2065_s1 = inlined_call_operand.vmem [shape: f32[1,32], index: 1, kind: input, shape index: {}]   ;;  %s2066_s2 = inlined_call_operand.vmem [shape: f32[1,32], index: 2, kind: input, shape index: {}]   ;;  %s2067_s3 = inlined_call_operand.vmem [shape: f32[32,96], index: 3, kind: input, shape index: {}]   ;;  %s2068_s4 = inlined_call_operand.vmem [shape: f32[1,96], index: 4, kind: input, shape index: {}]   ;;  %s2069_s5 = inlined_call_operand.vmem [shape: f32[512,96], index: 5, kind: output, shape index: {}]  }
   0x1 LB: > { %s1177_s19 = sadd.s32 4294967295, %s1401_s18   ;;  %p1181_p0 = scmp.ge.s32.totalorder %s1401_s18, 1  ;;  %s1401_s18 = sphi %s1433_s18, %s15_s18  }
   0x2   : > { %p188_p1 = scmp.lt.s32.totalorder %s1401_s18, 3 }
   0x4   : > { %p189_p2 = pnand %p1181_p0, %p188_p1 }
   0x5   : > { %s1182_s20 = sshll.u32 (!%p189_p2), %s1177_s19, 5 }
   0x6   : > { %192 = sbr.rel (%p189_p2) target bundleno = 585 (0x249), region = 40  ;;  %p217_p3 = scmp.lt.s32.totalorder (!%p189_p2), %s1182_s20, 63 }
   0xb   : > { %s2071_s20 = smov (!%p217_p3, %s1182_s20), 63  ;;  %vm262_vm0 = vcmask 261120   ;;  %vm1088_vm1 = vcmask 785408  }
   0xc   : > { %s1183_s21 = sshll.u32 %s2071_s20, 3 }
   0xd   : > { %s1449_s24 = scalar_lea.vmem %s2064_s0, %s1183_s21  ;;  %s1963_s16 = scalar_lea.vmem %s2069_s5, %s1183_s21 }
   0xe   : > { %v1452_v0 = vld [vmem:[%s1449_s24] sm:$0xff]  ;;  %v1455_v1 = vld [vmem:[%s1449_s24 + $0x8] sm:$0xff]  ;;  %v1472_v8 = vld [vmem:[%s1449_s24 + $0x10] sm:$0xff] }
   0xf   : > { %v1458_v2 = vld [vmem:[%s1449_s24 + $0x80] sm:$0xff]  ;;  %v263_v3 = vsel %vm262_vm0, %v1452_v0, 0.0  ;;  %v266_v4 = vsel %vm262_vm0, %v1455_v1, 0.0  ;;  %v1465_v5 = vld [vmem:[%s1449_s24 + $0x88] sm:$0xff]  ;;  %v1475_v9 = vld [vmem:[%s1449_s24 + $0x90] sm:$0xff]  ;;  %v269_v10 = vsel %vm262_vm0, %v1472_v8, 0.0 }
  0x10   : > { %264 = vadd.xlane.f32.xlu0 %v263_v3  ;;  %267 = vadd.xlane.f32.xlu1 %v266_v4  ;;  %v311_v6 = vsel %vm262_vm0, %v1458_v2, 0.0  ;;  %v314_v7 = vsel %vm262_vm0, %v1465_v5, 0.0  ;;  %v317_v11 = vsel %vm262_vm0, %v1475_v9, 0.0  ;;  %v1482_v12 = vld [vmem:[%s1449_s24 + $0x18] sm:$0xff]  ;;  %v1492_v16 = vld [vmem:[%s1449_s24 + $0x20] sm:$0xff]  ;;  %v1502_v20 = vld [vmem:[%s1449_s24 + $0x28] sm:$0xff] }
  0x11   : > { %v1485_v13 = vld [vmem:[%s1449_s24 + $0x98] sm:$0xff]  ;;  %v272_v14 = vsel %vm262_vm0, %v1482_v12, 0.0  ;;  %v1495_v17 = vld [vmem:[%s1449_s24 + $0xa0] sm:$0xff]  ;;  %v275_v18 = vsel %vm262_vm0, %v1492_v16, 0.0  ;;  %v1505_v21 = vld [vmem:[%s1449_s24 + $0xa8] sm:$0xff]  ;;  %v278_v22 = vsel %vm262_vm0, %v1502_v20, 0.0 }
  0x12   : > { %v320_v15 = vsel %vm262_vm0, %v1485_v13, 0.0  ;;  %v323_v19 = vsel %vm262_vm0, %v1495_v17, 0.0  ;;  %v326_v23 = vsel %vm262_vm0, %v1505_v21, 0.0  ;;  %v1512_v24 = vld [vmem:[%s1449_s24 + $0x30] sm:$0xff]  ;;  %v1522_v28 = vld [vmem:[%s1449_s24 + $0x38] sm:$0xff]  ;;  %v1532_v32 = vld [vmem:[%s1449_s24 + $0x40] sm:$0xff] }
  0x13   : > { %v1515_v25 = vld [vmem:[%s1449_s24 + $0xb0] sm:$0xff]  ;;  %v281_v26 = vsel %vm262_vm0, %v1512_v24, 0.0  ;;  %v1525_v29 = vld [vmem:[%s1449_s24 + $0xb8] sm:$0xff]  ;;  %v284_v30 = vsel %vm262_vm0, %v1522_v28, 0.0  ;;  %v1535_v33 = vld [vmem:[%s1449_s24 + $0xc0] sm:$0xff]  ;;  %v287_v34 = vsel %vm262_vm0, %v1532_v32, 0.0 }
  0x14   : > { %312 = vadd.xlane.f32.xlu0 %v311_v6  ;;  %315 = vadd.xlane.f32.xlu1 %v314_v7  ;;  %v329_v27 = vsel %vm262_vm0, %v1515_v25, 0.0  ;;  %v332_v31 = vsel %vm262_vm0, %v1525_v29, 0.0  ;;  %v335_v35 = vsel %vm262_vm0, %v1535_v33, 0.0  ;;  %v1542_v36 = vld [vmem:[%s1449_s24 + $0x48] sm:$0xff]  ;;  %v1552_v40 = vld [vmem:[%s1449_s24 + $0x50] sm:$0xff]  ;;  %v1562_v44 = vld [vmem:[%s1449_s24 + $0x58] sm:$0xff] }
  0x15   : > { %v1545_v37 = vld [vmem:[%s1449_s24 + $0xc8] sm:$0xff]  ;;  %v290_v38 = vsel %vm262_vm0, %v1542_v36, 0.0  ;;  %v1555_v41 = vld [vmem:[%s1449_s24 + $0xd0] sm:$0xff]  ;;  %v293_v42 = vsel %vm262_vm0, %v1552_v40, 0.0  ;;  %v1565_v45 = vld [vmem:[%s1449_s24 + $0xd8] sm:$0xff]  ;;  %v296_v46 = vsel %vm262_vm0, %v1562_v44, 0.0 }
  0x16   : > { %v338_v39 = vsel %vm262_vm0, %v1545_v37, 0.0  ;;  %v341_v43 = vsel %vm262_vm0, %v1555_v41, 0.0  ;;  %v344_v47 = vsel %vm262_vm0, %v1565_v45, 0.0  ;;  %v1572_v48 = vld [vmem:[%s1449_s24 + $0x60] sm:$0xff]  ;;  %v1582_v52 = vld [vmem:[%s1449_s24 + $0x68] sm:$0xff]  ;;  %v1592_v56 = vld [vmem:[%s1449_s24 + $0x70] sm:$0xff] }
  0x17   : > { %v1575_v49 = vld [vmem:[%s1449_s24 + $0xe0] sm:$0xff]  ;;  %v299_v50 = vsel %vm262_vm0, %v1572_v48, 0.0  ;;  %v1585_v53 = vld [vmem:[%s1449_s24 + $0xe8] sm:$0xff]  ;;  %v302_v54 = vsel %vm262_vm0, %v1582_v52, 0.0  ;;  %v1595_v57 = vld [vmem:[%s1449_s24 + $0xf0] sm:$0xff]  ;;  %v305_v58 = vsel %vm262_vm0, %v1592_v56, 0.0 }
  0x18   : > { %270 = vadd.xlane.f32.xlu0 %v269_v10  ;;  %318 = vadd.xlane.f32.xlu1 %v317_v11  ;;  %v347_v51 = vsel %vm262_vm0, %v1575_v49, 0.0  ;;  %v350_v55 = vsel %vm262_vm0, %v1585_v53, 0.0  ;;  %v353_v59 = vsel %vm262_vm0, %v1595_v57, 0.0  ;;  %v1602_v60 = vld [vmem:[%s1449_s24 + $0x78] sm:$0xff] }
  0x19   : > { %v1605_v61 = vld [vmem:[%s1449_s24 + $0xf8] sm:$0xff]  ;;  %v308_v62 = vsel %vm262_vm0, %v1602_v60, 0.0 }
  0x1a   : > { %v356_v63 = vsel %vm262_vm0, %v1605_v61, 0.0 }
  0x1c   : > { %273 = vadd.xlane.f32.xlu0 %v272_v14  ;;  %321 = vadd.xlane.f32.xlu1 %v320_v15 }
  0x20   : > { %276 = vadd.xlane.f32.xlu0 %v275_v18  ;;  %324 = vadd.xlane.f32.xlu1 %v323_v19 }
  0x24   : > { %279 = vadd.xlane.f32.xlu0 %v278_v22  ;;  %327 = vadd.xlane.f32.xlu1 %v326_v23 }
  0x28   : > { %282 = vadd.xlane.f32.xlu0 %v281_v26  ;;  %330 = vadd.xlane.f32.xlu1 %v329_v27 }
  0x2c   : > { %285 = vadd.xlane.f32.xlu0 %v284_v30  ;;  %333 = vadd.xlane.f32.xlu1 %v332_v31 }
  0x30   : > { %288 = vadd.xlane.f32.xlu0 %v287_v34  ;;  %336 = vadd.xlane.f32.xlu1 %v335_v35 }
  0x34   : > { %291 = vadd.xlane.f32.xlu0 %v290_v38  ;;  %339 = vadd.xlane.f32.xlu1 %v338_v39 }
  0x38   : > { %294 = vadd.xlane.f32.xlu0 %v293_v42  ;;  %342 = vadd.xlane.f32.xlu1 %v341_v43 }
  0x3c   : > { %297 = vadd.xlane.f32.xlu0 %v296_v46  ;;  %345 = vadd.xlane.f32.xlu1 %v344_v47 }
  0x40   : > { %300 = vadd.xlane.f32.xlu0 %v299_v50  ;;  %348 = vadd.xlane.f32.xlu1 %v347_v51 }
  0x44   : > { %303 = vadd.xlane.f32.xlu0 %v302_v54  ;;  %351 = vadd.xlane.f32.xlu1 %v350_v55 }
  0x48   : > { %306 = vadd.xlane.f32.xlu0 %v305_v58  ;;  %354 = vadd.xlane.f32.xlu1 %v353_v59 }
  0x4c   : > { %309 = vadd.xlane.f32.xlu0 %v308_v62  ;;  %357 = vadd.xlane.f32.xlu1 %v356_v63 }
  0x99   : > { %v265_v3 = vpop.xlane.xlu0 %264  ;;  %v268_v4 = vpop.xlane.xlu1 %267 }
  0x9a   : > { %v360_v6 = vmul.f32 0.03125, %v265_v3  ;;  %v361_v7 = vmul.f32 0.03125, %v268_v4 }
  0x9c   : > { %v1612_v10 = vsub.f32 %v1452_v0, %v360_v6  ;;  %v1615_v11 = vsub.f32 %v1455_v1, %v361_v7 }
  0x9d   : > { %v313_v14 = vpop.xlane.xlu0 %312  ;;  %v316_v15 = vpop.xlane.xlu1 %315 }
  0x9e   : > { %v376_v18 = vmul.f32 0.03125, %v313_v14  ;;  %v377_v19 = vmul.f32 0.03125, %v316_v15  ;;  %v424_v22 = vmul.f32 %v1612_v10, %v1612_v10  ;;  %v425_v23 = vmul.f32 %v1615_v11, %v1615_v11 }
  0xa0   : > { %v1622_v26 = vsub.f32 %v1458_v2, %v376_v18  ;;  %v1625_v27 = vsub.f32 %v1465_v5, %v377_v19  ;;  %v456_v0 = vsel %vm262_vm0, %v424_v22, 0.0  ;;  %v459_v31 = vsel %vm262_vm0, %v425_v23, 0.0 }
  0xa1   : > { %457 = vadd.xlane.f32.xlu0 %v456_v0  ;;  %v271_v1 = vpop.xlane.xlu0 %270  ;;  %v319_v30 = vpop.xlane.xlu1 %318 }
  0xa2   : > { %v362_v34 = vmul.f32 0.03125, %v271_v1  ;;  %v378_v35 = vmul.f32 0.03125, %v319_v30  ;;  %v440_v38 = vmul.f32 %v1622_v26, %v1622_v26  ;;  %v441_v39 = vmul.f32 %v1625_v27, %v1625_v27 }
  0xa4   : > { %v1634_v2 = vsub.f32 %v1472_v8, %v362_v34  ;;  %v1637_v5 = vsub.f32 %v1475_v9, %v378_v35  ;;  %v504_v42 = vsel %vm262_vm0, %v440_v38, 0.0  ;;  %v507_v47 = vsel %vm262_vm0, %v441_v39, 0.0 }
  0xa5   : > { %460 = vadd.xlane.f32.xlu0 %v459_v31  ;;  %505 = vadd.xlane.f32.xlu1 %v504_v42  ;;  %v274_v43 = vpop.xlane.xlu0 %273  ;;  %v322_v46 = vpop.xlane.xlu1 %321 }
  0xa6   : > { %v363_v50 = vmul.f32 0.03125, %v274_v43  ;;  %v379_v51 = vmul.f32 0.03125, %v322_v46  ;;  %v426_v54 = vmul.f32 %v1634_v2, %v1634_v2  ;;  %v442_v8 = vmul.f32 %v1637_v5, %v1637_v5 }
  0xa8   : > { %v1646_v55 = vsub.f32 %v1482_v12, %v363_v50  ;;  %v1649_v9 = vsub.f32 %v1485_v13, %v379_v51  ;;  %v462_v58 = vsel %vm262_vm0, %v426_v54, 0.0  ;;  %v510_v63 = vsel %vm262_vm0, %v442_v8, 0.0 }
  0xa9   : > { %508 = vadd.xlane.f32.xlu1 %v507_v47  ;;  %463 = vadd.xlane.f32.xlu0 %v462_v58  ;;  %v277_v59 = vpop.xlane.xlu0 %276  ;;  %v325_v62 = vpop.xlane.xlu1 %324 }
  0xaa   : > { %v364_v3 = vmul.f32 0.03125, %v277_v59  ;;  %v380_v4 = vmul.f32 0.03125, %v325_v62  ;;  %v427_v6 = vmul.f32 %v1646_v55, %v1646_v55  ;;  %v443_v12 = vmul.f32 %v1649_v9, %v1649_v9 }
  0xac   : > { %v1658_v7 = vsub.f32 %v1492_v16, %v364_v3  ;;  %v1661_v13 = vsub.f32 %v1495_v17, %v380_v4  ;;  %v465_v14 = vsel %vm262_vm0, %v427_v6, 0.0  ;;  %v513_v19 = vsel %vm262_vm0, %v443_v12, 0.0 }
  0xad   : > { %511 = vadd.xlane.f32.xlu1 %v510_v63  ;;  %466 = vadd.xlane.f32.xlu0 %v465_v14  ;;  %v280_v15 = vpop.xlane.xlu0 %279  ;;  %v328_v18 = vpop.xlane.xlu1 %327 }
  0xae   : > { %v365_v22 = vmul.f32 0.03125, %v280_v15  ;;  %v381_v23 = vmul.f32 0.03125, %v328_v18  ;;  %v428_v0 = vmul.f32 %v1658_v7, %v1658_v7  ;;  %v444_v16 = vmul.f32 %v1661_v13, %v1661_v13 }
  0xb0   : > { %v1670_v1 = vsub.f32 %v1502_v20, %v365_v22  ;;  %v1673_v17 = vsub.f32 %v1505_v21, %v381_v23  ;;  %v468_v30 = vsel %vm262_vm0, %v428_v0, 0.0  ;;  %v516_v35 = vsel %vm262_vm0, %v444_v16, 0.0 }
  0xb1   : > { %514 = vadd.xlane.f32.xlu1 %v513_v19  ;;  %469 = vadd.xlane.f32.xlu0 %v468_v30  ;;  %v283_v31 = vpop.xlane.xlu0 %282  ;;  %v331_v34 = vpop.xlane.xlu1 %330 }
  0xb2   : > { %v366_v38 = vmul.f32 0.03125, %v283_v31  ;;  %v382_v39 = vmul.f32 0.03125, %v331_v34  ;;  %v429_v42 = vmul.f32 %v1670_v1, %v1670_v1  ;;  %v445_v20 = vmul.f32 %v1673_v17, %v1673_v17 }
  0xb4   : > { %v1682_v43 = vsub.f32 %v1512_v24, %v366_v38  ;;  %v1685_v21 = vsub.f32 %v1515_v25, %v382_v39  ;;  %v471_v46 = vsel %vm262_vm0, %v429_v42, 0.0  ;;  %v519_v51 = vsel %vm262_vm0, %v445_v20, 0.0  ;;  %v758_v20 = vld [vmem:[%s2067_s3 + $0x10] sm:$0xff] }
  0xb5   : > { %517 = vadd.xlane.f32.xlu1 %v516_v35  ;;  %472 = vadd.xlane.f32.xlu0 %v471_v46  ;;  %v286_v47 = vpop.xlane.xlu0 %285  ;;  %v334_v50 = vpop.xlane.xlu1 %333 }
  0xb6   : > { %v367_v54 = vmul.f32 0.03125, %v286_v47  ;;  %v383_v8 = vmul.f32 0.03125, %v334_v50  ;;  %v430_v58 = vmul.f32 %v1682_v43, %v1682_v43  ;;  %v446_v24 = vmul.f32 %v1685_v21, %v1685_v21  ;;  %v757_v50 = vld [vmem:[%s2067_s3 + $0x8] sm:$0xff] }
  0xb8   : > { %v1694_v59 = vsub.f32 %v1522_v28, %v367_v54  ;;  %v1697_v25 = vsub.f32 %v1525_v29, %v383_v8  ;;  %v474_v62 = vsel %vm262_vm0, %v430_v58, 0.0  ;;  %v522_v4 = vsel %vm262_vm0, %v446_v24, 0.0 }
  0xb9   : > { %520 = vadd.xlane.f32.xlu1 %v519_v51  ;;  %475 = vadd.xlane.f32.xlu0 %v474_v62  ;;  %v289_v63 = vpop.xlane.xlu0 %288  ;;  %v337_v3 = vpop.xlane.xlu1 %336 }
  0xba   : > { %v368_v6 = vmul.f32 0.03125, %v289_v63  ;;  %v384_v12 = vmul.f32 0.03125, %v337_v3  ;;  %v431_v14 = vmul.f32 %v1694_v59, %v1694_v59  ;;  %v447_v28 = vmul.f32 %v1697_v25, %v1697_v25  ;;  %v756_v63 = vld [vmem:[%s2067_s3] sm:$0xff] }
  0xbc   : > { %v1706_v15 = vsub.f32 %v1532_v32, %v368_v6  ;;  %v1709_v29 = vsub.f32 %v1535_v33, %v384_v12  ;;  %v477_v18 = vsel %vm262_vm0, %v431_v14, 0.0  ;;  %v525_v23 = vsel %vm262_vm0, %v447_v28, 0.0  ;;  %v759_v33 = vld [vmem:[%s2067_s3 + $0x18] sm:$0xff] }
  0xbd   : > { %523 = vadd.xlane.f32.xlu1 %v522_v4  ;;  %478 = vadd.xlane.f32.xlu0 %v477_v18  ;;  %v292_v19 = vpop.xlane.xlu0 %291  ;;  %v340_v22 = vpop.xlane.xlu1 %339 }
  0xbe   : > { %v369_v0 = vmul.f32 0.03125, %v292_v19  ;;  %v385_v16 = vmul.f32 0.03125, %v340_v22  ;;  %v432_v30 = vmul.f32 %v1706_v15, %v1706_v15  ;;  %v448_v32 = vmul.f32 %v1709_v29, %v1709_v29  ;;  %1259 = vmatprep.subr.mxu0 %v759_v33  ;;  %1315 = vmatprep.subr.mxu1 %v759_v33 }
  0xbf   : > { %1260 = vmatpush3.msra.mxu0 %v759_v33  ;;  %1319 = vmatpush3.msra.mxu1 %v759_v33 }
  0xc0   : > { %v1721_v31 = vsub.f32 %v1542_v36, %v369_v0  ;;  %v1724_v34 = vsub.f32 %v1545_v37, %v385_v16  ;;  %v480_v35 = vsel %vm262_vm0, %v432_v30, 0.0  ;;  %v528_v42 = vsel %vm262_vm0, %v448_v32, 0.0  ;;  %1261 = vmatprep.subr.mxu0 %v758_v20  ;;  %1316 = vmatprep.subr.mxu1 %v758_v20 }
  0xc1   : > { %526 = vadd.xlane.f32.xlu1 %v525_v23  ;;  %481 = vadd.xlane.f32.xlu0 %v480_v35  ;;  %v295_v38 = vpop.xlane.xlu0 %294  ;;  %v343_v39 = vpop.xlane.xlu1 %342 }
  0xc2   : > { %v370_v46 = vmul.f32 0.03125, %v295_v38  ;;  %v386_v36 = vmul.f32 0.03125, %v343_v39  ;;  %v433_v37 = vmul.f32 %v1721_v31, %v1721_v31  ;;  %v449_v47 = vmul.f32 %v1724_v34, %v1724_v34  ;;  %1262 = vmatpush3.msra.mxu0 %v758_v20  ;;  %1320 = vmatpush3.msra.mxu1 %v758_v20 }
  0xc3   : > { %1263 = vmatprep.subr.mxu0 %v757_v50  ;;  %1317 = vmatprep.subr.mxu1 %v757_v50 }
  0xc4   : > { %v1739_v51 = vsub.f32 %v1552_v40, %v370_v46  ;;  %v1742_v54 = vsub.f32 %v1555_v41, %v386_v36  ;;  %v483_v8 = vsel %vm262_vm0, %v433_v37, 0.0  ;;  %v531_v62 = vsel %vm262_vm0, %v449_v47, 0.0  ;;  %1264 = vmatpush3.msra.mxu0 %v757_v50  ;;  %1321 = vmatpush3.msra.mxu1 %v757_v50 }
  0xc5   : > { %529 = vadd.xlane.f32.xlu1 %v528_v42  ;;  %484 = vadd.xlane.f32.xlu0 %v483_v8  ;;  %v298_v58 = vpop.xlane.xlu0 %297  ;;  %v346_v24 = vpop.xlane.xlu1 %345 }
  0xc6   : > { %v371_v3 = vmul.f32 0.03125, %v298_v58  ;;  %v387_v40 = vmul.f32 0.03125, %v346_v24  ;;  %v434_v41 = vmul.f32 %v1739_v51, %v1739_v51  ;;  %v450_v4 = vmul.f32 %v1742_v54, %v1742_v54  ;;  %1265 = vmatprep.subr.mxu0 %v756_v63  ;;  %1318 = vmatprep.subr.mxu1 %v756_v63 }
  0xc7   : > { %1266 = vmatpush3.msra.mxu0 %v756_v63  ;;  %1322 = vmatpush3.msra.mxu1 %v756_v63 }
  0xc8   : > { %v1754_v6 = vsub.f32 %v1562_v44, %v371_v3  ;;  %v1757_v12 = vsub.f32 %v1565_v45, %v387_v40  ;;  %v486_v14 = vsel %vm262_vm0, %v434_v41, 0.0  ;;  %v534_v19 = vsel %vm262_vm0, %v450_v4, 0.0 }
  0xc9   : > { %532 = vadd.xlane.f32.xlu1 %v531_v62  ;;  %487 = vadd.xlane.f32.xlu0 %v486_v14  ;;  %v301_v28 = vpop.xlane.xlu0 %300  ;;  %v349_v18 = vpop.xlane.xlu1 %348 }
  0xca   : > { %v372_v22 = vmul.f32 0.03125, %v301_v28  ;;  %v388_v23 = vmul.f32 0.03125, %v349_v18  ;;  %v435_v0 = vmul.f32 %v1754_v6, %v1754_v6  ;;  %v451_v44 = vmul.f32 %v1757_v12, %v1757_v12 }
  0xcc   : > { %v1766_v45 = vsub.f32 %v1572_v48, %v372_v22  ;;  %v1769_v16 = vsub.f32 %v1575_v49, %v388_v23  ;;  %v489_v30 = vsel %vm262_vm0, %v435_v0, 0.0  ;;  %v537_v35 = vsel %vm262_vm0, %v451_v44, 0.0 }
  0xcd   : > { %535 = vadd.xlane.f32.xlu1 %v534_v19  ;;  %490 = vadd.xlane.f32.xlu0 %v489_v30  ;;  %v304_v32 = vpop.xlane.xlu0 %303  ;;  %v352_v33 = vpop.xlane.xlu1 %351 }
  0xce   : > { %v373_v38 = vmul.f32 0.03125, %v304_v32  ;;  %v389_v39 = vmul.f32 0.03125, %v352_v33  ;;  %v436_v42 = vmul.f32 %v1766_v45, %v1766_v45  ;;  %v452_v48 = vmul.f32 %v1769_v16, %v1769_v16 }
  0xd0   : > { %v1778_v20 = vsub.f32 %v1582_v52, %v373_v38  ;;  %v1781_v49 = vsub.f32 %v1585_v53, %v389_v39  ;;  %v492_v46 = vsel %vm262_vm0, %v436_v42, 0.0  ;;  %v540_v47 = vsel %vm262_vm0, %v452_v48, 0.0 }
  0xd1   : > { %538 = vadd.xlane.f32.xlu1 %v537_v35  ;;  %493 = vadd.xlane.f32.xlu0 %v492_v46  ;;  %v307_v36 = vpop.xlane.xlu0 %306  ;;  %v355_v37 = vpop.xlane.xlu1 %354 }
  0xd2   : > { %v374_v50 = vmul.f32 0.03125, %v307_v36  ;;  %v390_v8 = vmul.f32 0.03125, %v355_v37  ;;  %v437_v58 = vmul.f32 %v1778_v20, %v1778_v20  ;;  %v453_v52 = vmul.f32 %v1781_v49, %v1781_v49 }
  0xd4   : > { %v1790_v24 = vsub.f32 %v1592_v56, %v374_v50  ;;  %v1793_v53 = vsub.f32 %v1595_v57, %v390_v8  ;;  %v495_v62 = vsel %vm262_vm0, %v437_v58, 0.0  ;;  %v543_v40 = vsel %vm262_vm0, %v453_v52, 0.0 }
  0xd5   : > { %541 = vadd.xlane.f32.xlu1 %v540_v47  ;;  %496 = vadd.xlane.f32.xlu0 %v495_v62  ;;  %v310_v63 = vpop.xlane.xlu0 %309  ;;  %v358_v3 = vpop.xlane.xlu1 %357 }
  0xd6   : > { %v375_v41 = vmul.f32 0.03125, %v310_v63  ;;  %v391_v4 = vmul.f32 0.03125, %v358_v3  ;;  %v438_v14 = vmul.f32 %v1790_v24, %v1790_v24  ;;  %v454_v56 = vmul.f32 %v1793_v53, %v1793_v53 }
  0xd8   : > { %v1802_v28 = vsub.f32 %v1602_v60, %v375_v41  ;;  %v1805_v57 = vsub.f32 %v1605_v61, %v391_v4  ;;  %v498_v18 = vsel %vm262_vm0, %v438_v14, 0.0  ;;  %v546_v19 = vsel %vm262_vm0, %v454_v56, 0.0 }
  0xd9   : > { %544 = vadd.xlane.f32.xlu1 %v543_v40  ;;  %499 = vadd.xlane.f32.xlu0 %v498_v18  ;;  %v1818_v18 = vld [vmem:[%s2065_s1] ss:$0 sm:$0xff] }
  0xda   : > { %v439_v22 = vmul.f32 %v1802_v28, %v1802_v28  ;;  %v455_v23 = vmul.f32 %v1805_v57, %v1805_v57 }
  0xdc   : > { %v501_v0 = vsel %vm262_vm0, %v439_v22, 0.0  ;;  %v549_v60 = vsel %vm262_vm0, %v455_v23, 0.0 }
  0xdd   : > { %547 = vadd.xlane.f32.xlu1 %v546_v19  ;;  %502 = vadd.xlane.f32.xlu0 %v501_v0 }
  0xe1   : > { %550 = vadd.xlane.f32.xlu1 %v549_v60 }
 0x12a   : > { %v458_v61 = vpop.xlane.xlu0 %457 }
 0x12b   : > { %v552_v44 = vmul.f32 0.03125, %v458_v61  ;;  %v1824_v61 = vld [vmem:[%s2066_s2] ss:$0 sm:$0xff] }
 0x12d   : > { %v584_v30 = vadd.f32 1e-05, %v552_v44 }
 0x12e   : > { %v506_v32 = vpop.xlane.xlu1 %505  ;;  %v461_v33 = vpop.xlane.xlu0 %460 }
 0x12f   : > { %1331 = vrsqrt.f32 %v584_v30  ;;  %v568_v35 = vmul.f32 0.03125, %v506_v32  ;;  %v553_v38 = vmul.f32 0.03125, %v461_v33 }
 0x131   : > { %v600_v39 = vadd.f32 1e-05, %v568_v35  ;;  %v585_v42 = vadd.f32 1e-05, %v553_v38 }
 0x132   : > { %v509_v48 = vpop.xlane.xlu1 %508  ;;  %v464_v46 = vpop.xlane.xlu0 %463 }
 0x133   : > { %1333 = vrsqrt.f32 %v600_v39  ;;  %v569_v36 = vmul.f32 0.03125, %v509_v48  ;;  %v554_v37 = vmul.f32 0.03125, %v464_v46 }
 0x134   : > { %1335 = vrsqrt.f32 %v585_v42 }
 0x135   : > { %v601_v47 = vadd.f32 1e-05, %v569_v36  ;;  %v586_v50 = vadd.f32 1e-05, %v554_v37 }
 0x136   : > { %v512_v8 = vpop.xlane.xlu1 %511  ;;  %v467_v58 = vpop.xlane.xlu0 %466 }
 0x137   : > { %1337 = vrsqrt.f32 %v601_v47  ;;  %v570_v52 = vmul.f32 0.03125, %v512_v8  ;;  %v555_v62 = vmul.f32 0.03125, %v467_v58 }
 0x138   : > { %1339 = vrsqrt.f32 %v586_v50 }
 0x139   : > { %v602_v63 = vadd.f32 1e-05, %v570_v52  ;;  %v587_v3 = vadd.f32 1e-05, %v555_v62 }
 0x13a   : > { %v515_v40 = vpop.xlane.xlu1 %514  ;;  %v470_v41 = vpop.xlane.xlu0 %469 }
 0x13b   : > { %1341 = vrsqrt.f32 %v602_v63  ;;  %v571_v4 = vmul.f32 0.03125, %v515_v40  ;;  %v556_v14 = vmul.f32 0.03125, %v470_v41 }
 0x13c   : > { %v1332_v56 = vpop.eup %1331  ;;  %1343 = vrsqrt.f32 %v587_v3 }
 0x13d   : > { %v603_v19 = vadd.f32 1e-05, %v571_v4  ;;  %v588_v22 = vadd.f32 1e-05, %v556_v14  ;;  %v648_v23 = vmul.f32 %v1332_v56, %v1612_v10 }
 0x13e   : > { %v518_v0 = vpop.xlane.xlu1 %517  ;;  %v473_v60 = vpop.xlane.xlu0 %472 }
 0x13f   : > { %1345 = vrsqrt.f32 %v603_v19  ;;  %v572_v44 = vmul.f32 0.03125, %v518_v0  ;;  %v557_v30 = vmul.f32 0.03125, %v473_v60  ;;  %v686_v32 = vmul.f32 %v1818_v18, %v648_v23 }
 0x140   : > { %v1334_v33 = vpop.eup %1333  ;;  %1347 = vrsqrt.f32 %v588_v22 }
 0x141   : > { %v1336_v35 = vpop.eup %1335  ;;  %v604_v38 = vadd.f32 1e-05, %v572_v44  ;;  %v589_v39 = vadd.f32 1e-05, %v557_v30  ;;  %v724_v42 = vadd.f32 %v1824_v61, %v686_v32  ;;  %v664_v10 = vmul.f32 %v1334_v33, %v1622_v26 }
 0x142   : > { %v521_v48 = vpop.xlane.xlu1 %520  ;;  %v476_v46 = vpop.xlane.xlu0 %475  ;;  %v649_v36 = vmul.f32 %v1336_v35, %v1615_v11 }
 0x143   : > { %1349 = vrsqrt.f32 %v604_v38  ;;  %v573_v37 = vmul.f32 0.03125, %v521_v48  ;;  %v558_v47 = vmul.f32 0.03125, %v476_v46  ;;  %1267 = vmatprep.mubr.msk.f32.mxu0 %vm262_vm0, %v724_v42  ;;  %v702_v50 = vmul.f32 %v1818_v18, %v664_v10 }
 0x144   : > { %v1338_v8 = vpop.eup %1337  ;;  %1351 = vrsqrt.f32 %v589_v39  ;;  %v687_v58 = vmul.f32 %v1818_v18, %v649_v36 }
 0x145   : > { %v1340_v52 = vpop.eup %1339  ;;  %v605_v62 = vadd.f32 1e-05, %v573_v37  ;;  %v590_v63 = vadd.f32 1e-05, %v558_v47  ;;  %v740_v26 = vadd.f32 %v1824_v61, %v702_v50  ;;  %v665_v3 = vmul.f32 %v1338_v8, %v1625_v27 }
 0x146   : > { %v524_v40 = vpop.xlane.xlu1 %523  ;;  %v479_v11 = vpop.xlane.xlu0 %478  ;;  %v725_v41 = vadd.f32 %v1824_v61, %v687_v58  ;;  %v650_v4 = vmul.f32 %v1340_v52, %v1634_v2 }
 0x147   : > { %1353 = vrsqrt.f32 %v605_v62  ;;  %v574_v14 = vmul.f32 0.03125, %v524_v40  ;;  %v559_v56 = vmul.f32 0.03125, %v479_v11  ;;  %1291 = vmatprep.mubr.msk.f32.mxu1 %vm262_vm0, %v740_v26  ;;  %v703_v19 = vmul.f32 %v1818_v18, %v665_v3 }
 0x148   : > { %v1342_v22 = vpop.eup %1341  ;;  %1355 = vrsqrt.f32 %v590_v63  ;;  %1268 = vmatmul.mubr.msk.f32.vlgmr.msra.gmra.mxu0 %vm262_vm0, %v725_v41  ;;  %v688_v23 = vmul.f32 %v1818_v18, %v650_v4 }
 0x149   : > { %v1344_v27 = vpop.eup %1343  ;;  %v606_v0 = vadd.f32 1e-05, %v574_v14  ;;  %v591_v60 = vadd.f32 1e-05, %v559_v56  ;;  %v741_v44 = vadd.f32 %v1824_v61, %v703_v19  ;;  %v666_v2 = vmul.f32 %v1342_v22, %v1637_v5 }
 0x14a   : > { %v527_v30 = vpop.xlane.xlu1 %526  ;;  %v482_v32 = vpop.xlane.xlu0 %481  ;;  %v726_v33 = vadd.f32 %v1824_v61, %v688_v23  ;;  %v651_v35 = vmul.f32 %v1344_v27, %v1646_v55 }
 0x14b   : > { %1357 = vrsqrt.f32 %v606_v0  ;;  %v575_v38 = vmul.f32 0.03125, %v527_v30  ;;  %v560_v39 = vmul.f32 0.03125, %v482_v32  ;;  %1292 = vmatmul.mubr.msk.f32.vlgmr.msra.gmra.mxu1 %vm262_vm0, %v741_v44  ;;  %v704_v42 = vmul.f32 %v1818_v18, %v666_v2 }
 0x14c   : > { %v1346_v10 = vpop.eup %1345  ;;  %1359 = vrsqrt.f32 %v591_v60  ;;  %1270 = vmatprep.mubr.msk.f32.mxu0 %vm262_vm0, %v726_v33  ;;  %v689_v48 = vmul.f32 %v1818_v18, %v651_v35 }
 0x14d   : > { %v1348_v5 = vpop.eup %1347  ;;  %v607_v46 = vadd.f32 1e-05, %v575_v38  ;;  %v592_v36 = vadd.f32 1e-05, %v560_v39  ;;  %v742_v37 = vadd.f32 %v1824_v61, %v704_v42  ;;  %v667_v55 = vmul.f32 %v1346_v10, %v1649_v9 }
 0x14e   : > { %v530_v47 = vpop.xlane.xlu1 %529  ;;  %v485_v50 = vpop.xlane.xlu0 %484  ;;  %v727_v8 = vadd.f32 %v1824_v61, %v689_v48  ;;  %v652_v58 = vmul.f32 %v1348_v5, %v1658_v7 }
 0x14f   : > { %1361 = vrsqrt.f32 %v607_v46  ;;  %v576_v52 = vmul.f32 0.03125, %v530_v47  ;;  %v561_v62 = vmul.f32 0.03125, %v485_v50  ;;  %1294 = vmatprep.mubr.msk.f32.mxu1 %vm262_vm0, %v742_v37  ;;  %v705_v63 = vmul.f32 %v1818_v18, %v667_v55 }
 0x150   : > { %v1350_v26 = vpop.eup %1349  ;;  %1363 = vrsqrt.f32 %v592_v36  ;;  %1271 = vmatmul.mubr.msk.f32.gmra.mxu0 %vm262_vm0, %v727_v8  ;;  %v690_v3 = vmul.f32 %v1818_v18, %v652_v58 }
 0x151   : > { %v1352_v9 = vpop.eup %1351  ;;  %v608_v40 = vadd.f32 1e-05, %v576_v52  ;;  %v593_v11 = vadd.f32 1e-05, %v561_v62  ;;  %v743_v41 = vadd.f32 %v1824_v61, %v705_v63  ;;  %v668_v7 = vmul.f32 %v1350_v26, %v1661_v13 }
 0x152   : > { %v533_v4 = vpop.xlane.xlu1 %532  ;;  %v488_v14 = vpop.xlane.xlu0 %487  ;;  %v728_v56 = vadd.f32 %v1824_v61, %v690_v3  ;;  %v653_v19 = vmul.f32 %v1352_v9, %v1670_v1 }
 0x153   : > { %1365 = vrsqrt.f32 %v608_v40  ;;  %v577_v22 = vmul.f32 0.03125, %v533_v4  ;;  %v562_v23 = vmul.f32 0.03125, %v488_v14  ;;  %1295 = vmatmul.mubr.msk.f32.gmra.mxu1 %vm262_vm0, %v743_v41  ;;  %v706_v27 = vmul.f32 %v1818_v18, %v668_v7 }
 0x154   : > { %v1354_v0 = vpop.eup %1353  ;;  %1367 = vrsqrt.f32 %v593_v11  ;;  %1273 = vmatprep.mubr.msk.f32.mxu0 %vm262_vm0, %v728_v56  ;;  %v691_v60 = vmul.f32 %v1818_v18, %v653_v19 }
 0x155   : > { %v1356_v13 = vpop.eup %1355  ;;  %v609_v44 = vadd.f32 1e-05, %v577_v22  ;;  %v594_v2 = vadd.f32 1e-05, %v562_v23  ;;  %v744_v30 = vadd.f32 %v1824_v61, %v706_v27  ;;  %v669_v1 = vmul.f32 %v1354_v0, %v1673_v17 }
 0x156   : > { %v536_v32 = vpop.xlane.xlu1 %535  ;;  %v491_v33 = vpop.xlane.xlu0 %490  ;;  %v729_v35 = vadd.f32 %v1824_v61, %v691_v60  ;;  %v654_v38 = vmul.f32 %v1356_v13, %v1682_v43 }
 0x157   : > { %1369 = vrsqrt.f32 %v609_v44  ;;  %v578_v39 = vmul.f32 0.03125, %v536_v32  ;;  %v563_v42 = vmul.f32 0.03125, %v491_v33  ;;  %1297 = vmatprep.mubr.msk.f32.mxu1 %vm262_vm0, %v744_v30  ;;  %v707_v10 = vmul.f32 %v1818_v18, %v669_v1 }
 0x158   : > { %v1358_v48 = vpop.eup %1357  ;;  %1371 = vrsqrt.f32 %v594_v2  ;;  %1274 = vmatmul.mubr.msk.f32.gmra.mxu0 %vm262_vm0, %v729_v35  ;;  %v692_v5 = vmul.f32 %v1818_v18, %v654_v38 }
 0x159   : > { %v1360_v17 = vpop.eup %1359  ;;  %v610_v46 = vadd.f32 1e-05, %v578_v39  ;;  %v595_v36 = vadd.f32 1e-05, %v563_v42  ;;  %v745_v37 = vadd.f32 %v1824_v61, %v707_v10  ;;  %v670_v43 = vmul.f32 %v1358_v48, %v1685_v21 }
 0x15a   : > { %v539_v55 = vpop.xlane.xlu1 %538  ;;  %v494_v47 = vpop.xlane.xlu0 %493  ;;  %v730_v50 = vadd.f32 %v1824_v61, %v692_v5  ;;  %v655_v8 = vmul.f32 %v1360_v17, %v1694_v59 }
 0x15b   : > { %1373 = vrsqrt.f32 %v610_v46  ;;  %v579_v58 = vmul.f32 0.03125, %v539_v55  ;;  %v564_v52 = vmul.f32 0.03125, %v494_v47  ;;  %1298 = vmatmul.mubr.msk.f32.gmra.mxu1 %vm262_vm0, %v745_v37  ;;  %v708_v62 = vmul.f32 %v1818_v18, %v670_v43 }
 0x15c   : > { %v1362_v63 = vpop.eup %1361  ;;  %1375 = vrsqrt.f32 %v595_v36  ;;  %1276 = vmatprep.mubr.msk.f32.mxu0 %vm262_vm0, %v730_v50  ;;  %v693_v26 = vmul.f32 %v1818_v18, %v655_v8 }
 0x15d   : > { %v1364_v21 = vpop.eup %1363  ;;  %v611_v3 = vadd.f32 1e-05, %v579_v58  ;;  %v596_v9 = vadd.f32 1e-05, %v564_v52  ;;  %v746_v40 = vadd.f32 %v1824_v61, %v708_v62  ;;  %v671_v59 = vmul.f32 %v1362_v63, %v1697_v25 }
 0x15e   : > { %v542_v11 = vpop.xlane.xlu1 %541  ;;  %v497_v41 = vpop.xlane.xlu0 %496  ;;  %v731_v7 = vadd.f32 %v1824_v61, %v693_v26  ;;  %v656_v4 = vmul.f32 %v1364_v21, %v1706_v15 }
 0x15f   : > { %1377 = vrsqrt.f32 %v611_v3  ;;  %v580_v14 = vmul.f32 0.03125, %v542_v11  ;;  %v565_v56 = vmul.f32 0.03125, %v497_v41  ;;  %1300 = vmatprep.mubr.msk.f32.mxu1 %vm262_vm0, %v746_v40  ;;  %v709_v19 = vmul.f32 %v1818_v18, %v671_v59 }
 0x160   : > { %v1366_v22 = vpop.eup %1365  ;;  %1379 = vrsqrt.f32 %v596_v9  ;;  %1277 = vmatmul.mubr.msk.f32.gmra.mxu0 %vm262_vm0, %v731_v7  ;;  %v694_v23 = vmul.f32 %v1818_v18, %v656_v4 }
 0x161   : > { %v1368_v25 = vpop.eup %1367  ;;  %v612_v27 = vadd.f32 1e-05, %v580_v14  ;;  %v597_v0 = vadd.f32 1e-05, %v565_v56  ;;  %v747_v60 = vadd.f32 %v1824_v61, %v709_v19  ;;  %v672_v15 = vmul.f32 %v1366_v22, %v1709_v29 }
 0x162   : > { %v545_v13 = vpop.xlane.xlu1 %544  ;;  %v500_v44 = vpop.xlane.xlu0 %499  ;;  %v732_v2 = vadd.f32 %v1824_v61, %v694_v23  ;;  %v657_v30 = vmul.f32 %v1368_v25, %v1721_v31 }
 0x163   : > { %1381 = vrsqrt.f32 %v612_v27  ;;  %v581_v1 = vmul.f32 0.03125, %v545_v13  ;;  %v566_v32 = vmul.f32 0.03125, %v500_v44  ;;  %1301 = vmatmul.mubr.msk.f32.gmra.mxu1 %vm262_vm0, %v747_v60  ;;  %v710_v33 = vmul.f32 %v1818_v18, %v672_v15 }
 0x164   : > { %v1370_v35 = vpop.eup %1369  ;;  %1383 = vrsqrt.f32 %v597_v0  ;;  %1279 = vmatprep.mubr.msk.f32.mxu0 %vm262_vm0, %v732_v2  ;;  %v695_v38 = vmul.f32 %v1818_v18, %v657_v30 }
 0x165   : > { %v1372_v29 = vpop.eup %1371  ;;  %v613_v39 = vadd.f32 1e-05, %v581_v1  ;;  %v598_v42 = vadd.f32 1e-05, %v566_v32  ;;  %v748_v10 = vadd.f32 %v1824_v61, %v710_v33  ;;  %v673_v31 = vmul.f32 %v1370_v35, %v1724_v34 }
 0x166   : > { %v548_v48 = vpop.xlane.xlu1 %547  ;;  %v503_v5 = vpop.xlane.xlu0 %502  ;;  %v733_v17 = vadd.f32 %v1824_v61, %v695_v38  ;;  %v658_v46 = vmul.f32 %v1372_v29, %v1739_v51 }
 0x167   : > { %1385 = vrsqrt.f32 %v613_v39  ;;  %v582_v36 = vmul.f32 0.03125, %v548_v48  ;;  %v567_v37 = vmul.f32 0.03125, %v503_v5  ;;  %1303 = vmatprep.mubr.msk.f32.mxu1 %vm262_vm0, %v748_v10  ;;  %v711_v43 = vmul.f32 %v1818_v18, %v673_v31  ;;  %v1956_v10 = vld [vmem:[%s2068_s4] ss:$0 sm:$0xff] }
 0x168   : > { %v1374_v55 = vpop.eup %1373  ;;  %1387 = vrsqrt.f32 %v598_v42  ;;  %1280 = vmatmul.mubr.msk.f32.gmra.mxu0 %vm262_vm0, %v733_v17  ;;  %v696_v47 = vmul.f32 %v1818_v18, %v658_v46 }
 0x169   : > { %v1376_v34 = vpop.eup %1375  ;;  %v614_v50 = vadd.f32 1e-05, %v582_v36  ;;  %v599_v8 = vadd.f32 1e-05, %v567_v37  ;;  %v749_v58 = vadd.f32 %v1824_v61, %v711_v43  ;;  %v674_v51 = vmul.f32 %v1374_v55, %v1742_v54 }
 0x16a   : > { %v551_v52 = vpop.xlane.xlu1 %550  ;;  %v734_v62 = vadd.f32 %v1824_v61, %v696_v47  ;;  %v659_v63 = vmul.f32 %v1376_v34, %v1754_v6 }
 0x16b   : > { %1389 = vrsqrt.f32 %v614_v50  ;;  %v583_v26 = vmul.f32 0.03125, %v551_v52  ;;  %1304 = vmatmul.mubr.msk.f32.gmra.mxu1 %vm262_vm0, %v749_v58  ;;  %v712_v21 = vmul.f32 %v1818_v18, %v674_v51 }
 0x16c   : > { %v1378_v3 = vpop.eup %1377  ;;  %1391 = vrsqrt.f32 %v599_v8  ;;  %1282 = vmatprep.mubr.msk.f32.mxu0 %vm262_vm0, %v734_v62  ;;  %v697_v9 = vmul.f32 %v1818_v18, %v659_v63 }
 0x16d   : > { %v1380_v40 = vpop.eup %1379  ;;  %v615_v59 = vadd.f32 1e-05, %v583_v26  ;;  %v750_v54 = vadd.f32 %v1824_v61, %v712_v21  ;;  %v675_v11 = vmul.f32 %v1378_v3, %v1757_v12 }
 0x16e   : > { %v735_v6 = vadd.f32 %v1824_v61, %v697_v9  ;;  %v660_v41 = vmul.f32 %v1380_v40, %v1766_v45 }
 0x16f   : > { %1393 = vrsqrt.f32 %v615_v59  ;;  %1306 = vmatprep.mubr.msk.f32.mxu1 %vm262_vm0, %v750_v54  ;;  %v713_v7 = vmul.f32 %v1818_v18, %v675_v11 }
 0x170   : > { %v1382_v4 = vpop.eup %1381  ;;  %1283 = vmatmul.mubr.msk.f32.gmra.mxu0 %vm262_vm0, %v735_v6  ;;  %v698_v14 = vmul.f32 %v1818_v18, %v660_v41 }
 0x171   : > { %v1384_v56 = vpop.eup %1383  ;;  %v751_v19 = vadd.f32 %v1824_v61, %v713_v7  ;;  %v676_v22 = vmul.f32 %v1382_v4, %v1769_v16 }
 0x172   : > { %v736_v12 = vadd.f32 %v1824_v61, %v698_v14  ;;  %v661_v23 = vmul.f32 %v1384_v56, %v1778_v20 }
 0x173   : > { %1307 = vmatmul.mubr.msk.f32.gmra.mxu1 %vm262_vm0, %v751_v19  ;;  %v714_v45 = vmul.f32 %v1818_v18, %v676_v22 }
 0x174   : > { %v1386_v25 = vpop.eup %1385  ;;  %1285 = vmatprep.mubr.msk.f32.mxu0 %vm262_vm0, %v736_v12  ;;  %v699_v27 = vmul.f32 %v1818_v18, %v661_v23 }
 0x175   : > { %v1388_v0 = vpop.eup %1387  ;;  %v752_v60 = vadd.f32 %v1824_v61, %v714_v45  ;;  %v677_v15 = vmul.f32 %v1386_v25, %v1781_v49 }
 0x176   : > { %v737_v16 = vadd.f32 %v1824_v61, %v699_v27  ;;  %v662_v13 = vmul.f32 %v1388_v0, %v1790_v24 }
 0x177   : > { %1309 = vmatprep.mubr.msk.f32.mxu1 %vm262_vm0, %v752_v60  ;;  %v715_v20 = vmul.f32 %v1818_v18, %v677_v15 }
 0x178   : > { %v1390_v44 = vpop.eup %1389  ;;  %1286 = vmatmul.mubr.msk.f32.gmra.mxu0 %vm262_vm0, %v737_v16  ;;  %v700_v2 = vmul.f32 %v1818_v18, %v662_v13 }
 0x179   : > { %v1392_v30 = vpop.eup %1391  ;;  %v753_v1 = vadd.f32 %v1824_v61, %v715_v20  ;;  %v678_v32 = vmul.f32 %v1390_v44, %v1793_v53 }
 0x17a   : > { %v738_v49 = vadd.f32 %v1824_v61, %v700_v2  ;;  %v663_v33 = vmul.f32 %v1392_v30, %v1802_v28 }
 0x17b   : > { %1310 = vmatmul.mubr.msk.f32.gmra.mxu1 %vm262_vm0, %v753_v1  ;;  %v716_v24 = vmul.f32 %v1818_v18, %v678_v32 }
 0x17c   : > { %v1394_v35 = vpop.eup %1393  ;;  %1288 = vmatprep.mubr.msk.f32.mxu0 %vm262_vm0, %v738_v49  ;;  %v701_v38 = vmul.f32 %v1818_v18, %v663_v33 }
 0x17d   : > { %v754_v29 = vadd.f32 %v1824_v61, %v716_v24  ;;  %v679_v39 = vmul.f32 %v1394_v35, %v1805_v57 }
 0x17e   : > { %v739_v53 = vadd.f32 %v1824_v61, %v701_v38 }
 0x17f   : > { %1312 = vmatprep.mubr.msk.f32.mxu1 %vm262_vm0, %v754_v29  ;;  %v717_v42 = vmul.f32 %v1818_v18, %v679_v39 }
 0x180   : > { %1289 = vmatmul.mubr.msk.f32.gmra.mxu0 %vm262_vm0, %v739_v53 }
 0x181   : > { %v755_v28 = vadd.f32 %v1824_v61, %v717_v42 }
 0x183   : > { %1313 = vmatmul.mubr.msk.f32.gmra.mxu1 %vm262_vm0, %v755_v28 }
 0x208   : > { %v1269_v57 = vpop.f32.mrf.mxu0 }
 0x209   : > { %v935_v18 = vadd.f32 %v1269_v57, %v1956_v10 }
 0x20a   : > { %v929_v61 = vpop.f32.mrf.mxu0 }
 0x20b   : > { %1090 = vst.msk [vmem:[%s1963_s16 + $0x8] sm:$0xff] %vm1088_vm1, %v935_v18  ;;  %v930_v31 = vadd.f32 %v1956_v10, %v929_v61  ;;  %v1293_v48 = vpop.f32.mrf.mxu1 }
 0x20c   : > { %v1015_v5 = vadd.f32 %v1293_v48, %v1956_v10 }
 0x20d   : > { %1089 = vst.msk [vmem:[%s1963_s16] sm:$0xff] %vm1088_vm1, %v930_v31  ;;  %v1009_v17 = vpop.f32.mrf.mxu1 }
 0x20e   : > { %1106 = vst.msk [vmem:[%s1963_s16 + $0x88] sm:$0xff] %vm1088_vm1, %v1015_v5  ;;  %v1010_v46 = vadd.f32 %v1956_v10, %v1009_v17 }
 0x210   : > { %1105 = vst.msk [vmem:[%s1963_s16 + $0x80] sm:$0xff] %vm1088_vm1, %v1010_v46  ;;  %v1272_v36 = vpop.f32.mrf.mxu0 }
 0x211   : > { %v945_v37 = vadd.f32 %v1272_v36, %v1956_v10 }
 0x212   : > { %v939_v43 = vpop.f32.mrf.mxu0 }
 0x213   : > { %1092 = vst.msk [vmem:[%s1963_s16 + $0x18] sm:$0xff] %vm1088_vm1, %v945_v37  ;;  %v940_v55 = vadd.f32 %v1956_v10, %v939_v43  ;;  %v1296_v47 = vpop.f32.mrf.mxu1 }
 0x214   : > { %v1025_v34 = vadd.f32 %v1296_v47, %v1956_v10 }
 0x215   : > { %1091 = vst.msk [vmem:[%s1963_s16 + $0x10] sm:$0xff] %vm1088_vm1, %v940_v55  ;;  %v1019_v50 = vpop.f32.mrf.mxu1 }
 0x216   : > { %1108 = vst.msk [vmem:[%s1963_s16 + $0x98] sm:$0xff] %vm1088_vm1, %v1025_v34  ;;  %v1020_v8 = vadd.f32 %v1956_v10, %v1019_v50 }
 0x218   : > { %1107 = vst.msk [vmem:[%s1963_s16 + $0x90] sm:$0xff] %vm1088_vm1, %v1020_v8  ;;  %v1275_v58 = vpop.f32.mrf.mxu0 }
 0x219   : > { %v955_v51 = vadd.f32 %v1275_v58, %v1956_v10 }
 0x21a   : > { %v949_v52 = vpop.f32.mrf.mxu0 }
 0x21b   : > { %1094 = vst.msk [vmem:[%s1963_s16 + $0x28] sm:$0xff] %vm1088_vm1, %v955_v51  ;;  %v950_v62 = vadd.f32 %v1956_v10, %v949_v52  ;;  %v1299_v63 = vpop.f32.mrf.mxu1 }
 0x21c   : > { %v1035_v26 = vadd.f32 %v1299_v63, %v1956_v10 }
 0x21d   : > { %1093 = vst.msk [vmem:[%s1963_s16 + $0x20] sm:$0xff] %vm1088_vm1, %v950_v62  ;;  %v1029_v21 = vpop.f32.mrf.mxu1 }
 0x21e   : > { %1110 = vst.msk [vmem:[%s1963_s16 + $0xa8] sm:$0xff] %vm1088_vm1, %v1035_v26  ;;  %v1030_v3 = vadd.f32 %v1956_v10, %v1029_v21 }
 0x220   : > { %1109 = vst.msk [vmem:[%s1963_s16 + $0xa0] sm:$0xff] %vm1088_vm1, %v1030_v3  ;;  %v1278_v9 = vpop.f32.mrf.mxu0 }
 0x221   : > { %v965_v40 = vadd.f32 %v1278_v9, %v1956_v10 }
 0x222   : > { %v959_v59 = vpop.f32.mrf.mxu0 }
 0x223   : > { %1096 = vst.msk [vmem:[%s1963_s16 + $0x38] sm:$0xff] %vm1088_vm1, %v965_v40  ;;  %v960_v54 = vadd.f32 %v1956_v10, %v959_v59  ;;  %v1302_v11 = vpop.f32.mrf.mxu1 }
 0x224   : > { %v1045_v6 = vadd.f32 %v1302_v11, %v1956_v10 }
 0x225   : > { %1095 = vst.msk [vmem:[%s1963_s16 + $0x30] sm:$0xff] %vm1088_vm1, %v960_v54  ;;  %v1039_v41 = vpop.f32.mrf.mxu1 }
 0x226   : > { %1112 = vst.msk [vmem:[%s1963_s16 + $0xb8] sm:$0xff] %vm1088_vm1, %v1045_v6  ;;  %v1040_v7 = vadd.f32 %v1956_v10, %v1039_v41 }
 0x228   : > { %1111 = vst.msk [vmem:[%s1963_s16 + $0xb0] sm:$0xff] %vm1088_vm1, %v1040_v7  ;;  %v1281_v4 = vpop.f32.mrf.mxu0 }
 0x229   : > { %v975_v14 = vadd.f32 %v1281_v4, %v1956_v10 }
 0x22a   : > { %v969_v56 = vpop.f32.mrf.mxu0 }
 0x22b   : > { %1098 = vst.msk [vmem:[%s1963_s16 + $0x48] sm:$0xff] %vm1088_vm1, %v975_v14  ;;  %v970_v19 = vadd.f32 %v1956_v10, %v969_v56  ;;  %v1305_v22 = vpop.f32.mrf.mxu1 }
 0x22c   : > { %v1055_v12 = vadd.f32 %v1305_v22, %v1956_v10 }
 0x22d   : > { %1097 = vst.msk [vmem:[%s1963_s16 + $0x40] sm:$0xff] %vm1088_vm1, %v970_v19  ;;  %v1049_v23 = vpop.f32.mrf.mxu1 }
 0x22e   : > { %1114 = vst.msk [vmem:[%s1963_s16 + $0xc8] sm:$0xff] %vm1088_vm1, %v1055_v12  ;;  %v1050_v45 = vadd.f32 %v1956_v10, %v1049_v23 }
 0x230   : > { %1113 = vst.msk [vmem:[%s1963_s16 + $0xc0] sm:$0xff] %vm1088_vm1, %v1050_v45  ;;  %v1284_v25 = vpop.f32.mrf.mxu0 }
 0x231   : > { %v985_v27 = vadd.f32 %v1284_v25, %v1956_v10 }
 0x232   : > { %v979_v0 = vpop.f32.mrf.mxu0 }
 0x233   : > { %1100 = vst.msk [vmem:[%s1963_s16 + $0x58] sm:$0xff] %vm1088_vm1, %v985_v27  ;;  %v980_v60 = vadd.f32 %v1956_v10, %v979_v0  ;;  %v1308_v15 = vpop.f32.mrf.mxu1 }
 0x234   : > { %v1065_v16 = vadd.f32 %v1308_v15, %v1956_v10 }
 0x235   : > { %1099 = vst.msk [vmem:[%s1963_s16 + $0x50] sm:$0xff] %vm1088_vm1, %v980_v60  ;;  %v1059_v13 = vpop.f32.mrf.mxu1 }
 0x236   : > { %1116 = vst.msk [vmem:[%s1963_s16 + $0xd8] sm:$0xff] %vm1088_vm1, %v1065_v16  ;;  %v1060_v20 = vadd.f32 %v1956_v10, %v1059_v13 }
 0x238   : > { %1115 = vst.msk [vmem:[%s1963_s16 + $0xd0] sm:$0xff] %vm1088_vm1, %v1060_v20  ;;  %v1287_v44 = vpop.f32.mrf.mxu0 }
 0x239   : > { %v995_v2 = vadd.f32 %v1287_v44, %v1956_v10 }
 0x23a   : > { %v989_v30 = vpop.f32.mrf.mxu0 }
 0x23b   : > { %1102 = vst.msk [vmem:[%s1963_s16 + $0x68] sm:$0xff] %vm1088_vm1, %v995_v2  ;;  %v990_v1 = vadd.f32 %v1956_v10, %v989_v30  ;;  %v1311_v32 = vpop.f32.mrf.mxu1 }
 0x23c   : > { %v1075_v49 = vadd.f32 %v1311_v32, %v1956_v10 }
 0x23d   : > { %1101 = vst.msk [vmem:[%s1963_s16 + $0x60] sm:$0xff] %vm1088_vm1, %v990_v1  ;;  %v1069_v33 = vpop.f32.mrf.mxu1 }
 0x23e   : > { %1118 = vst.msk [vmem:[%s1963_s16 + $0xe8] sm:$0xff] %vm1088_vm1, %v1075_v49  ;;  %v1070_v24 = vadd.f32 %v1956_v10, %v1069_v33 }
 0x240   : > { %1117 = vst.msk [vmem:[%s1963_s16 + $0xe0] sm:$0xff] %vm1088_vm1, %v1070_v24  ;;  %v1290_v35 = vpop.f32.mrf.mxu0 }
 0x241   : > { %v1005_v38 = vadd.f32 %v1290_v35, %v1956_v10 }
 0x242   : > { %v999_v29 = vpop.f32.mrf.mxu0 }
 0x243   : > { %1104 = vst.msk [vmem:[%s1963_s16 + $0x78] sm:$0xff] %vm1088_vm1, %v1005_v38  ;;  %v1000_v39 = vadd.f32 %v1956_v10, %v999_v29  ;;  %v1314_v53 = vpop.f32.mrf.mxu1 }
 0x244   : > { %v1085_v42 = vadd.f32 %v1314_v53, %v1956_v10 }
 0x245   : > { %1103 = vst.msk [vmem:[%s1963_s16 + $0x70] sm:$0xff] %vm1088_vm1, %v1000_v39  ;;  %v1079_v28 = vpop.f32.mrf.mxu1 }
 0x246   : > { %1120 = vst.msk [vmem:[%s1963_s16 + $0xf8] sm:$0xff] %vm1088_vm1, %v1085_v42  ;;  %v1080_v57 = vadd.f32 %v1956_v10, %v1079_v28 }
 0x248   : > { %1119 = vst.msk [vmem:[%s1963_s16 + $0xf0] sm:$0xff] %vm1088_vm1, %v1080_v57 }
 0x249 PF: > { %s15_s18 = sadd.s32 1, %s1401_s18  }
 0x24a   : > { %p12_p4 = scmp.ge.s32.totalorder %s15_s18, 4  }
 0x24c   :  { %14 = sbr.rel (!%p12_p4) target bundleno = 1 (0x1), region = 70 }

</bundles_post_ra>
